<compile_context>
chip_gen: v5e
topology: v5e:2x2
jax: 0.10.0
libtpu: 0.0.40
codegen_flags: <defaults>
</compile_context>

<pallas_src>
import jax
import jax.numpy as jnp
from jax import lax
from jax.experimental import pallas as pl
from jax.experimental.pallas import tpu as pltpu

SCALE_FACTOR = 10.0
EPS = 1e-5


def _round_up(x, m):
    return (x + m - 1) // m * m


def dist_linear_kernel(x_ref, w_ref, o_ref):
    # x_ref: (tm, K)   w_ref: (tn, K)   o_ref: (tm, tn)
    xf = x_ref[...].astype(jnp.float32)
    wf = w_ref[...].astype(jnp.float32)

    # Row L2 norms: lane reductions over the feature axis -> (rows, 1).
    x_norm = jnp.sqrt(jnp.sum(xf * xf, axis=1, keepdims=True))
    w_norm = jnp.sqrt(jnp.sum(wf * wf, axis=1, keepdims=True))

    # Normalize exactly like the reference (divide by norm + eps); padded
    # rows are all-zero -> 0 / eps = 0 -> zero output rows/cols.
    xn = (xf / (x_norm + EPS)).astype(x_ref.dtype)
    wn = (wf / (w_norm + EPS)).astype(w_ref.dtype)

    # NT contraction on the MXU: (tm, K) x (tn, K) -> (tm, tn), f32 accumulate.
    cos = lax.dot_general(
        xn,
        wn,
        dimension_numbers=(((1,), (1,)), ((), ())),
        preferred_element_type=jnp.float32,
    )
    o_ref[...] = (SCALE_FACTOR * cos).astype(o_ref.dtype)


def dist_linear(x, weight):
    """x: (B, indim), weight: (outdim, indim) -> (B, outdim) = 10 * cosine sim."""
    B, indim = x.shape
    outdim, indim_w = weight.shape
    assert indim == indim_w

    K = _round_up(indim, 128)                 # full feature dim, lane aligned
    tm = min(_round_up(B, 8), 128)            # sublane-aligned batch tile
    tn = min(_round_up(outdim, 128), 512)     # lane-dense class tile

    # VMEM guard: keep double-buffered blocks + normalization temporaries
    # (~16 bytes per element of the length-K rows) well under the 32 MB
    # scoped-VMEM limit.  Shrink the class tile first, then the batch tile.
    budget = 24 * 1024 * 1024
    while (tm + tn) * K * 16 > budget and tn > 128:
        tn -= 128
    while (tm + tn) * K * 16 > budget and tm > 8:
        tm -= 8
    # TODO(synk): for extremely large indim (K beyond ~12k at f32) a K-tiled
    # accumulating variant would be needed; classifier-head feature dims don't
    # get anywhere near that.

    M = _round_up(B, tm)
    N = _round_up(outdim, tn)

    # Pad only when required; padded entries contribute exact zeros.
    x_p = x if (M == B and K == indim) else jnp.pad(
        x, ((0, M - B), (0, K - indim)))
    w_p = weight if (N == outdim and K == indim) else jnp.pad(
        weight, ((0, N - outdim), (0, K - indim)))

    out = pl.pallas_call(
        dist_linear_kernel,
        out_shape=jax.ShapeDtypeStruct((M, N), x.dtype),
        grid_spec=pltpu.PrefetchScalarGridSpec(
            num_scalar_prefetch=0,
            grid=(M // tm, N // tn),
            in_specs=[
                pl.BlockSpec((tm, K), lambda i, j: (i, 0)),   # x rows
                pl.BlockSpec((tn, K), lambda i, j: (j, 0)),   # W rows (native)
            ],
            out_specs=pl.BlockSpec((tm, tn), lambda i, j: (i, j)),
        ),
        compiler_params=pltpu.CompilerParams(
            dimension_semantics=("parallel", "parallel"),
            vmem_limit_bytes=32 * 1024 * 1024,
        ),
    )(x_p, w_p)

    if M != B or N != outdim:
        out = out[:B, :outdim]
    return out


def dist_linear_ref(x, weight):
    # Pure-JAX reference mirroring the PyTorch forward exactly.
    x_norm = jnp.linalg.norm(x, axis=1, keepdims=True)
    x_normalized = x / (x_norm + EPS)
    w_norm = jnp.linalg.norm(weight, axis=1, keepdims=True)
    w_normalized = weight / (w_norm + EPS)
    return SCALE_FACTOR * (x_normalized @ w_normalized.T)


if __name__ == "__main__":
    key = jax.random.PRNGKey(0)

    def check(B, indim, outdim, case_key):
        kx, kw = jax.random.split(case_key)
        x = jax.random.normal(kx, (B, indim), dtype=jnp.float32)
        bound = 1.0 / (indim ** 0.5)
        w = jax.random.uniform(
            kw, (outdim, indim), dtype=jnp.float32, minval=-bound, maxval=bound)
        out = jax.block_until_ready(dist_linear(x, w))
        ref = dist_linear_ref(x, w)
        assert out.shape == (B, outdim)
        assert jnp.allclose(out, ref, atol=1e-4, rtol=1e-4), (
            f"mismatch vs reference (B={B}, indim={indim}, outdim={outdim})")

    # Case 1: small shapes implied by the module (single-tile grid after padding).
    check(8, 32, 16, jax.random.fold_in(key, 0))
    # Case 2: non-aligned shapes exercising feature/class padding.
    check(16, 640, 300, jax.random.fold_in(key, 1))
    # Case 3: multi-tile grid in both the batch and class dimensions.
    check(136, 384, 700, jax.random.fold_in(key, 2))

    print("KERNEL_OK")
</pallas_src>

<mosaic_0001>
module attributes {stable_mosaic.version = 11 : i64} {
  func.func @dist_linear_kernel(%arg0: i32, %arg1: i32, %arg2: memref<8x128xf32, #tpu.memory_space<vmem>>, %arg3: memref<128x128xf32, #tpu.memory_space<vmem>>, %arg4: memref<8x128xf32, #tpu.memory_space<vmem>>) attributes {dimension_semantics = [#tpu.dimension_semantics<parallel>, #tpu.dimension_semantics<parallel>], iteration_bounds = array<i64: 1, 1>, scalar_prefetch = 0 : i64, scratch_operands = 0 : i64, tpu.core_type = #tpu.core_type<tc>, window_params = [{transform_indices = @transform_0, window_bounds = array<i64: 8, 128>}, {transform_indices = @transform_1, window_bounds = array<i64: 128, 128>}, {transform_indices = @transform_2, window_bounds = array<i64: 8, 128>}]} {
    %c0 = arith.constant 0 : index
    %c0_0 = arith.constant 0 : index
    %0 = vector.load %arg2[%c0, %c0_0] : memref<8x128xf32, #tpu.memory_space<vmem>>, vector<8x128xf32>
    %c0_1 = arith.constant 0 : index
    %c0_2 = arith.constant 0 : index
    %1 = vector.load %arg3[%c0_1, %c0_2] : memref<128x128xf32, #tpu.memory_space<vmem>>, vector<128x128xf32>
    %2 = arith.mulf %0, %0 : vector<8x128xf32>
    %cst = arith.constant dense<0.000000e+00> : vector<8xf32>
    %3 = vector.multi_reduction <add>, %2, %cst [1] : vector<8x128xf32> to vector<8xf32>
    %4 = vector.shape_cast %3 : vector<8xf32> to vector<8x1xf32>
    %5 = math.sqrt %4 : vector<8x1xf32>
    %6 = arith.mulf %1, %1 : vector<128x128xf32>
    %cst_3 = arith.constant dense<0.000000e+00> : vector<128xf32>
    %7 = vector.multi_reduction <add>, %6, %cst_3 [1] : vector<128x128xf32> to vector<128xf32>
    %8 = vector.shape_cast %7 : vector<128xf32> to vector<128x1xf32>
    %9 = math.sqrt %8 : vector<128x1xf32>
    %cst_4 = arith.constant 9.99999974E-6 : f32
    %10 = vector.broadcast %cst_4 : f32 to vector<8x1xf32>
    %11 = arith.addf %5, %10 : vector<8x1xf32>
    %12 = vector.broadcast %11 : vector<8x1xf32> to vector<8x128xf32>
    %13 = arith.divf %0, %12 : vector<8x128xf32>
    %cst_5 = arith.constant 9.99999974E-6 : f32
    %14 = vector.broadcast %cst_5 : f32 to vector<128x1xf32>
    %15 = arith.addf %9, %14 : vector<128x1xf32>
    %16 = vector.broadcast %15 : vector<128x1xf32> to vector<128x128xf32>
    %17 = arith.divf %1, %16 : vector<128x128xf32>
    %cst_6 = arith.constant dense<0.000000e+00> : vector<8x128xf32>
    %18 = tpu.matmul %13, %17, %cst_6 {dimension_numbers = #tpu.dot_dimension_numbers<[1], [1], [0], [0], [0, 0, 1, 0], [], []>} : vector<8x128xf32>, vector<128x128xf32>, vector<8x128xf32> -> vector<8x128xf32>
    %cst_7 = arith.constant 1.000000e+01 : f32
    %19 = vector.broadcast %cst_7 : f32 to vector<8x128xf32>
    %20 = arith.mulf %19, %18 : vector<8x128xf32>
    %c0_8 = arith.constant 0 : index
    %c0_9 = arith.constant 0 : index
    %21 = vector.load %arg4[%c0_8, %c0_9] : memref<8x128xf32, #tpu.memory_space<vmem>>, vector<8x128xf32>
    tpu.vector_store %arg4[%c0_8, %c0_9], %20 {strides = array<i32>} : memref<8x128xf32, #tpu.memory_space<vmem>>, vector<8x128xf32>,
    return
  }
  func.func @transform_0(%arg0: i32, %arg1: i32) -> (i32, i32) {
    %c0_i32 = arith.constant 0 : i32
    %c0_i32_0 = arith.constant 0 : i32
    return %arg0, %c0_i32 : i32, i32
  }
  func.func @transform_1(%arg0: i32, %arg1: i32) -> (i32, i32) {
    %c0_i32 = arith.constant 0 : i32
    %c0_i32_0 = arith.constant 0 : i32
    return %arg1, %c0_i32 : i32, i32
  }
  func.func @transform_2(%arg0: i32, %arg1: i32) -> (i32, i32) {
    %c0_i32 = arith.constant 0 : i32
    return %arg0, %arg1 : i32, i32
  }
}

</mosaic_0001>

<bundles_post_ra>
// kernel: tpu_custom_call.1
= control target key start
LH: loop header
LB: loop body
LE: loop exit
PB: predicated region body
PF: predicated region fallthrough
CT: control target
= control target key end

     0   :  { %7 = vsyncpa [#allocation3], 0  ;;  %s1437_s0 = inlined_call_operand.hbm [shape: f32[8,128], index: 0, kind: input, shape index: {}]   ;;  %s1438_s1 = inlined_call_operand.hbm [shape: f32[128,128], index: 1, kind: input, shape index: {}]   ;;  %s1439_s2 = inlined_call_operand.hbm [shape: f32[8,128], index: 2, kind: output, shape index: {}]  }
   0x1   :  { %8 = vsyncpa [#allocation6], 0 }
   0x2   :  { %9 = vsyncpa [#allocation4], 0  ;;  %s15_s11 = sshll.u32 %s1437_s0, 4  ;;  %s783_s12 = smov [#allocation2]   ;;  %s16_s11 = int_to_ptr.hbm [resolvable:$true] %s15_s11 }
   0x3   :  { %s17_s13 = sshll.u32 %s783_s12, 4  ;;  %s25_s16 = sshll.u32 %s1438_s1, 4  ;;  %s18_s13 = int_to_ptr.vmem [resolvable:$true] %s17_s13  ;;  %s26_s16 = int_to_ptr.hbm [resolvable:$true] %s25_s16 }
   0x4   :  { %20 = dma.hbm_to_vmem [thread:$0]  %s16_s11, 128, %s18_s13, [#allocation3]  }
   0x5   :  { %s784_s17 = smov [#allocation5]   ;;  %s785_s19 = smov 128  }
   0x6   :  { %s27_s18 = sshll.u32 %s784_s17, 4  ;;  %s786_s20 = smov 8   ;;  %s28_s18 = int_to_ptr.vmem [resolvable:$true] %s27_s18 }
   0x7   :  { %33 = dma.hbm_to_vmem [thread:$0]  %s26_s16, 2048, %s28_s18, [#allocation6], %s785_s19, %s785_s19, %s786_s20  }
   0x8   :  { %777 = dma.done.wait [#allocation3], 128  }
   0x9   :  { %778 = vsyncadd [#allocation3], 4294967168 }
   0xa   :  { %779 = dma.done.wait [#allocation6], 2048  }
   0xb   :  { %780 = vsyncadd [#allocation6], 4294965248  ;;  %v809_v0 = vld [vmem:[#allocation5 + $0x78] sm:$0xff]  ;;  %v811_v1 = vld [vmem:[#allocation5 + $0x68] sm:$0xff]  ;;  %s787_s0 = smov [#allocation7]   ;;  %s615_s23 = sshll.u32 %s1439_s2, 4  ;;  %s616_s23 = int_to_ptr.hbm [resolvable:$true] %s615_s23 }
   0xc   :  { %v813_v2 = vld [vmem:[#allocation5 + $0x58] sm:$0xff]  ;;  %v89_v3 = vmul.f32 %v809_v0, %v809_v0  ;;  %v87_v4 = vmul.f32 %v811_v1, %v811_v1  ;;  %v821_v6 = vld [vmem:[#allocation5 + $0x70] sm:$0xff]  ;;  %v823_v7 = vld [vmem:[#allocation5 + $0x60] sm:$0xff]  ;;  %s613_s1 = sshll.u32 %s787_s0, 4  ;;  %s614_s1 = int_to_ptr.vmem [resolvable:$true] %s613_s1 }
   0xd   :  { %v85_v5 = vmul.f32 %v813_v2, %v813_v2  ;;  %v825_v8 = vld [vmem:[#allocation5 + $0x50] sm:$0xff]  ;;  %v88_v9 = vmul.f32 %v821_v6, %v821_v6  ;;  %v86_v10 = vmul.f32 %v823_v7, %v823_v7  ;;  %v833_v12 = vld [vmem:[#allocation5 + $0x48] sm:$0xff]  ;;  %v835_v13 = vld [vmem:[#allocation5 + $0x40] sm:$0xff] }
   0xe   :  { %120 = vadd.xlane.f32.xlu0 %v89_v3  ;;  %116 = vadd.xlane.f32.xlu1 %v87_v4  ;;  %v84_v11 = vmul.f32 %v825_v8, %v825_v8  ;;  %v837_v14 = vld [vmem:[#allocation5 + $0x38] sm:$0xff]  ;;  %v83_v15 = vmul.f32 %v833_v12, %v833_v12  ;;  %v82_v16 = vmul.f32 %v835_v13, %v835_v13  ;;  %v845_v18 = vld [vmem:[#allocation5 + $0x30] sm:$0xff]  ;;  %v847_v19 = vld [vmem:[#allocation5 + $0x28] sm:$0xff] }
   0xf   :  { %112 = vadd.xlane.f32.xlu2 %v85_v5  ;;  %v81_v17 = vmul.f32 %v837_v14, %v837_v14  ;;  %v47_v20 = vld [vmem:[#allocation5 + $0x20] sm:$0xff]  ;;  %v80_v21 = vmul.f32 %v845_v18, %v845_v18  ;;  %v79_v22 = vmul.f32 %v847_v19, %v847_v19  ;;  %v46_v24 = vld [vmem:[#allocation5 + $0x18] sm:$0xff]  ;;  %v45_v25 = vld [vmem:[#allocation5 + $0x10] sm:$0xff] }
  0x10   :  { %v78_v23 = vmul.f32 %v47_v20, %v47_v20  ;;  %v44_v26 = vld [vmem:[#allocation5 + $0x8] sm:$0xff]  ;;  %v77_v27 = vmul.f32 %v46_v24, %v46_v24  ;;  %v76_v28 = vmul.f32 %v45_v25, %v45_v25  ;;  %v43_v30 = vld [vmem:[#allocation5] sm:$0xff]  ;;  %v42_v31 = vld [vmem:[#allocation2] sm:$0xff] }
  0x11   :  { %v75_v29 = vmul.f32 %v44_v26, %v44_v26  ;;  %v74_v32 = vmul.f32 %v43_v30, %v43_v30  ;;  %v59_v33 = vmul.f32 %v42_v31, %v42_v31 }
  0x16   :  { %118 = vadd.xlane.f32.xlu0 %v88_v9  ;;  %114 = vadd.xlane.f32.xlu1 %v86_v10 }
  0x17   :  { %110 = vadd.xlane.f32.xlu2 %v84_v11 }
  0x1e   :  { %108 = vadd.xlane.f32.xlu0 %v83_v15  ;;  %106 = vadd.xlane.f32.xlu1 %v82_v16 }
  0x1f   :  { %104 = vadd.xlane.f32.xlu2 %v81_v17 }
  0x26   :  { %102 = vadd.xlane.f32.xlu0 %v80_v21  ;;  %100 = vadd.xlane.f32.xlu1 %v79_v22 }
  0x27   :  { %98 = vadd.xlane.f32.xlu2 %v78_v23 }
  0x2e   :  { %96 = vadd.xlane.f32.xlu0 %v77_v27  ;;  %94 = vadd.xlane.f32.xlu1 %v76_v28 }
  0x2f   :  { %92 = vadd.xlane.f32.xlu2 %v75_v29 }
  0x36   :  { %90 = vadd.xlane.f32.xlu0 %v74_v32  ;;  %60 = vadd.xlane.f32.xlu1 %v59_v33 }
  0x81   :  { %v853_v34 = vpop.xlane.xlu0 %120  ;;  %v855_v35 = vpop.xlane.xlu1 %116 }
  0x82   :  { %v857_v36 = vpop.xlane.xlu2 %112  ;;  %631 = vrsqrt.f32 %v855_v35  ;;  %v312_v22 = vand.u32 2147483648, %v853_v34  ;;  %vm285_vm0 = vcmp.eq.f32.partialorder %v855_v35, inf  ;;  %vm309_vm1 = vcmp.eq.f32.partialorder %v853_v34, inf }
  0x83   :  { %633 = vrsqrt.f32 %v857_v36  ;;  %vm287_vm2 = vcmp.eq.f32.partialorder %v855_v35, 0.0  ;;  %v288_v29 = vand.u32 2147483648, %v855_v35  ;;  %vm261_vm3 = vcmp.eq.f32.partialorder %v857_v36, inf }
  0x84   :  { %635 = vrsqrt.f32 %v853_v34  ;;  %vm263_vm4 = vcmp.eq.f32.partialorder %v857_v36, 0.0  ;;  %v264_v33 = vand.u32 2147483648, %v857_v36  ;;  %vm311_vm12 = vcmp.eq.f32.partialorder %v853_v34, 0.0 }
  0x88   :  { %v632_v37 = vpop.eup %631 }
  0x89   :  { %v862_v38 = vpop.xlane.xlu0 %118  ;;  %v864_v39 = vpop.xlane.xlu1 %114  ;;  %v279_v43 = vmul.f32 %v632_v37, %v855_v35 }
  0x8a   :  { %v634_v40 = vpop.eup %633  ;;  %637 = vrsqrt.f32 %v862_v38  ;;  %v867_v41 = vpop.xlane.xlu2 %110  ;;  %vm297_vm5 = vcmp.eq.f32.partialorder %v862_v38, inf  ;;  %vm273_vm6 = vcmp.eq.f32.partialorder %v864_v39, inf  ;;  %vm299_vm7 = vcmp.eq.f32.partialorder %v862_v38, 0.0 }
  0x8b   :  { %v636_v42 = vpop.eup %635  ;;  %639 = vrsqrt.f32 %v864_v39  ;;  %v255_v44 = vmul.f32 %v634_v40, %v857_v36  ;;  %v280_v46 = vmul.f32 %v632_v37, %v279_v43  ;;  %vm249_vm8 = vcmp.eq.f32.partialorder %v867_v41, inf }
  0x8c   :  { %641 = vrsqrt.f32 %v867_v41  ;;  %v303_v45 = vmul.f32 %v636_v42, %v853_v34  ;;  %vm275_vm9 = vcmp.eq.f32.partialorder %v864_v39, 0.0  ;;  %vm251_vm10 = vcmp.eq.f32.partialorder %v867_v41, 0.0 }
  0x8d   :  { %v256_v49 = vmul.f32 %v634_v40, %v255_v44  ;;  %v281_v56 = vmul.f32 0.5, %v280_v46 }
  0x8e   :  { %v304_v53 = vmul.f32 %v636_v42, %v303_v45 }
  0x8f   :  { %v257_v59 = vmul.f32 0.5, %v256_v49  ;;  %v282_v62 = vsub.f32 1.5, %v281_v56  ;;  %v276_v56 = vand.u32 2147483648, %v864_v39 }
  0x90   :  { %v638_v47 = vpop.eup %637  ;;  %v305_v61 = vmul.f32 0.5, %v304_v53 }
  0x91   :  { %v874_v48 = vpop.eup %639  ;;  %v291_v50 = vmul.f32 %v638_v47, %v862_v38  ;;  %v877_v51 = vpop.xlane.xlu0 %108  ;;  %v258_v5 = vsub.f32 1.5, %v257_v59  ;;  %v283_v20 = vmul.f32 %v632_v37, %v282_v62 }
  0x92   :  { %v879_v52 = vpop.xlane.xlu1 %106  ;;  %643 = vrsqrt.f32 %v877_v51  ;;  %v882_v54 = vpop.xlane.xlu2 %104  ;;  %v267_v57 = vmul.f32 %v874_v48, %v864_v39  ;;  %v306_v16 = vsub.f32 1.5, %v305_v61  ;;  %vm237_vm11 = vcmp.eq.f32.partialorder %v877_v51, inf }
  0x93   :  { %v884_v55 = vpop.eup %641  ;;  %v292_v60 = vmul.f32 %v638_v47, %v291_v50  ;;  %645 = vrsqrt.f32 %v879_v52  ;;  %v259_v25 = vmul.f32 %v634_v40, %v258_v5  ;;  %v284_v32 = vmul.f32 %v283_v20, %v855_v35 }
  0x94   :  { %v243_v58 = vmul.f32 %v884_v55, %v867_v41  ;;  %v268_v63 = vmul.f32 %v874_v48, %v267_v57  ;;  %647 = vrsqrt.f32 %v882_v54  ;;  %v307_v28 = vmul.f32 %v636_v42, %v306_v16 }
  0x95   :  { %v293_v9 = vmul.f32 0.5, %v292_v60  ;;  %v300_v40 = vand.u32 2147483648, %v862_v38  ;;  %v260_v45 = vmul.f32 %v259_v25, %v857_v36  ;;  %vm239_vm13 = vcmp.eq.f32.partialorder %v877_v51, 0.0 }
  0x96   :  { %v244_v4 = vmul.f32 %v884_v55, %v243_v58  ;;  %v269_v21 = vmul.f32 0.5, %v268_v63  ;;  %v308_v53 = vmul.f32 %v307_v28, %v853_v34  ;;  %vm213_vm14 = vcmp.eq.f32.partialorder %v882_v54, inf }
  0x97   :  { %v294_v26 = vsub.f32 1.5, %v293_v9  ;;  %vm225_vm15 = vcmp.eq.f32.partialorder %v879_v52, inf }
  0x98   :  { %v892_v3 = vpop.eup %643  ;;  %v245_v23 = vmul.f32 0.5, %v244_v4  ;;  %v270_v37 = vsub.f32 1.5, %v269_v21  ;;  %v252_v4 = vand.u32 2147483648, %v867_v41  ;;  %v240_v21 = vand.u32 2147483648, %v877_v51 }
  0x99   :  { %v231_v10 = vmul.f32 %v892_v3, %v877_v51  ;;  %v898_v11 = vpop.xlane.xlu0 %102  ;;  %v902_v17 = vpop.eup %645  ;;  %v295_v46 = vmul.f32 %v638_v47, %v294_v26  ;;  %v286_v47 = vsel %vm285_vm0, %v855_v35, %v284_v32 }
  0x9a   :  { %v900_v15 = vpop.xlane.xlu1 %100  ;;  %649 = vrsqrt.f32 %v898_v11  ;;  %v907_v24 = vpop.xlane.xlu2 %98  ;;  %v219_v30 = vmul.f32 %v902_v17, %v879_v52  ;;  %v246_v42 = vsub.f32 1.5, %v245_v23  ;;  %v271_v61 = vmul.f32 %v874_v48, %v270_v37 }
  0x9b   :  { %v232_v27 = vmul.f32 %v892_v3, %v231_v10  ;;  %651 = vrsqrt.f32 %v900_v15  ;;  %v917_v31 = vpop.eup %647  ;;  %v262_v10 = vsel %vm261_vm3, %v857_v36, %v260_v45  ;;  %v296_v48 = vmul.f32 %v295_v46, %v862_v38 }
  0x9c   :  { %v207_v43 = vmul.f32 %v917_v31, %v882_v54  ;;  %653 = vrsqrt.f32 %v907_v24  ;;  %v220_v57 = vmul.f32 %v902_v17, %v219_v30  ;;  %v247_v63 = vmul.f32 %v884_v55, %v246_v42 }
  0x9d   :  { %v233_v49 = vmul.f32 0.5, %v232_v27  ;;  %v964_v55 = vsel %vm309_vm1, %v853_v34, %v308_v53  ;;  %v968_v20 = vsel %vm287_vm2, %v288_v29, %v286_v47  ;;  %v272_v27 = vmul.f32 %v271_v61, %v864_v39 }
  0x9e   :  { %v208_v62 = vmul.f32 %v917_v31, %v207_v43  ;;  %v221_v23 = vmul.f32 0.5, %v220_v57  ;;  %v980_v35 = vsel %vm263_vm4, %v264_v33, %v262_v10  ;;  %v248_v29 = vmul.f32 %v247_v63, %v867_v41 }
  0x9f   :  { %v234_v16 = vsub.f32 1.5, %v233_v49  ;;  %v228_v37 = vand.u32 2147483648, %v879_v52  ;;  %v298_v45 = vsel %vm297_vm5, %v862_v38, %v296_v48  ;;  %v216_v53 = vand.u32 2147483648, %v882_v54 }
  0xa0   :  { %v926_v44 = vpop.eup %649  ;;  %v209_v28 = vmul.f32 0.5, %v208_v62  ;;  %v222_v49 = vsub.f32 1.5, %v221_v23  ;;  %v301_v63 = vsel %vm299_vm7, %v300_v40, %v298_v45  ;;  %vm201_vm0 = vcmp.eq.f32.partialorder %v898_v11, inf }
  0xa1   :  { %v930_v50 = vpop.xlane.xlu0 %96  ;;  %v195_v58 = vmul.f32 %v926_v44, %v898_v11  ;;  %v940_v60 = vpop.eup %651  ;;  %v235_v46 = vmul.f32 %v892_v3, %v234_v16  ;;  %v274_v3 = vsel %vm273_vm6, %v864_v39, %v272_v27  ;;  %vm189_vm1 = vcmp.eq.f32.partialorder %v900_v15, inf }
  0xa2   :  { %v938_v59 = vpop.xlane.xlu1 %94  ;;  %655 = vrsqrt.f32 %v930_v50  ;;  %v183_v9 = vmul.f32 %v940_v60, %v900_v15  ;;  %v971_v25 = vpop.xlane.xlu2 %92  ;;  %v210_v61 = vsub.f32 1.5, %v209_v28  ;;  %v1028_v27 = vsel %vm275_vm9, %v276_v56, %v274_v3 }
  0xa3   :  { %v196_v5 = vmul.f32 %v926_v44, %v195_v58  ;;  %657 = vrsqrt.f32 %v938_v59  ;;  %v973_v26 = vpop.eup %653  ;;  %v236_v48 = vmul.f32 %v235_v46, %v877_v51  ;;  %v223_v28 = vmul.f32 %v902_v17, %v222_v49 }
  0xa4   :  { %v184_v32 = vmul.f32 %v940_v60, %v183_v9  ;;  %v171_v42 = vmul.f32 %v973_v26, %v907_v24  ;;  %659 = vrsqrt.f32 %v971_v25  ;;  %v204_v9 = vand.u32 2147483648, %v898_v11 }
  0xa5   :  { %v197_v30 = vmul.f32 0.5, %v196_v5  ;;  %v250_v5 = vsel %vm249_vm8, %v867_v41, %v248_v29  ;;  %v211_v29 = vmul.f32 %v917_v31, %v210_v61  ;;  %v192_v45 = vand.u32 2147483648, %v900_v15 }
  0xa6   :  { %v185_v36 = vmul.f32 0.5, %v184_v32  ;;  %v172_v57 = vmul.f32 %v973_v26, %v171_v42  ;;  %v1041_v39 = vsel %vm251_vm10, %v252_v4, %v250_v5  ;;  %vm227_vm2 = vcmp.eq.f32.partialorder %v879_v52, 0.0 }
  0xa7   :  { %v198_v62 = vsub.f32 1.5, %v197_v30  ;;  %vm215_vm3 = vcmp.eq.f32.partialorder %v882_v54, 0.0  ;;  %v180_v17 = vand.u32 2147483648, %v907_v24  ;;  %v238_v56 = vsel %vm237_vm11, %v877_v51, %v236_v48 }
  0xa8   :  { %v987_v43 = vpop.eup %655  ;;  %v186_v16 = vsub.f32 1.5, %v185_v36  ;;  %v173_v23 = vmul.f32 0.5, %v172_v57  ;;  %vm191_vm4 = vcmp.eq.f32.partialorder %v900_v15, 0.0  ;;  %v224_v49 = vmul.f32 %v223_v28, %v879_v52 }
  0xa9   :  { %v994_v33 = vpop.xlane.xlu0 %90  ;;  %v159_v58 = vmul.f32 %v987_v43, %v930_v50  ;;  %v1001_v47 = vpop.eup %657  ;;  %v199_v42 = vmul.f32 %v926_v44, %v198_v62  ;;  %vm203_vm5 = vcmp.eq.f32.partialorder %v898_v11, 0.0  ;;  %vm177_vm6 = vcmp.eq.f32.partialorder %v907_v24, inf }
  0xaa   :  { %661 = vrsqrt.f32 %v994_v33  ;;  %v147_v38 = vmul.f32 %v1001_v47, %v938_v59  ;;  %v1022_v40 = vpop.xlane.xlu1 %60  ;;  %v660_v32 = vpop.eup %659  ;;  %v187_v36 = vmul.f32 %v940_v60, %v186_v16  ;;  %v174_v41 = vsub.f32 1.5, %v173_v23 }
  0xab   :  { %v160_v10 = vmul.f32 %v987_v43, %v159_v58  ;;  %v135_v31 = vmul.f32 %v660_v32, %v971_v25  ;;  %663 = vrsqrt.f32 %v1022_v40  ;;  %v168_v58 = vand.u32 2147483648, %v930_v50 }
  0xac   :  { %v148_v46 = vmul.f32 %v1001_v47, %v147_v38  ;;  %v212_v61 = vmul.f32 %v211_v29, %v882_v54  ;;  %v200_v62 = vmul.f32 %v199_v42, %v898_v11  ;;  %vm165_vm7 = vcmp.eq.f32.partialorder %v930_v50, inf }
  0xad   :  { %v161_v30 = vmul.f32 0.5, %v160_v10  ;;  %v136_v3 = vmul.f32 %v660_v32, %v135_v31  ;;  %v313_v5 = vsel %vm311_vm12, %v312_v22, %v964_v55  ;;  %v1070_v10 = vsel %vm239_vm13, %v240_v21, %v238_v56 }
  0xae   :  { %v149_v4 = vmul.f32 0.5, %v148_v46  ;;  %v1072_v23 = vadd.f32 1e-05, %v313_v5  ;;  %v188_v38 = vmul.f32 %v187_v36, %v900_v15  ;;  %v175_v28 = vmul.f32 %v973_v26, %v174_v41 }
  0xaf   :  { %v162_v57 = vsub.f32 1.5, %v161_v30  ;;  %v137_v16 = vmul.f32 0.5, %v136_v3  ;;  %vm153_vm8 = vcmp.eq.f32.partialorder %v938_v59, inf  ;;  %v1077_v29 = vadd.f32 1e-05, %v301_v63 }
  0xb0   :  { %v662_v44 = vpop.eup %661  ;;  %v150_v48 = vsub.f32 1.5, %v149_v4  ;;  %v226_v51 = vsel %vm225_vm15, %v879_v52, %v224_v49  ;;  %665 = vrcp.f32 %v1072_v23  ;;  %v214_v21 = vsel %vm213_vm14, %v882_v54, %v212_v61 }
  0xb1   :  { %v123_v60 = vmul.f32 %v662_v44, %v994_v33  ;;  %v1079_v34 = vpop.eup %663  ;;  %v163_v22 = vmul.f32 %v987_v43, %v162_v57  ;;  %v138_v55 = vsub.f32 1.5, %v137_v16  ;;  %v202_v26 = vsel %vm201_vm0, %v898_v11, %v200_v62 }
  0xb2   :  { %v156_v63 = vand.u32 2147483648, %v938_v59  ;;  %v151_v46 = vmul.f32 %v1001_v47, %v150_v48  ;;  %v63_v43 = vmul.f32 %v1079_v34, %v1022_v40  ;;  %667 = vrcp.f32 %v1077_v29 }
  0xb3   :  { %v124_v30 = vmul.f32 %v662_v44, %v123_v60  ;;  %v139_v31 = vmul.f32 %v660_v32, %v138_v55  ;;  %v1101_v56 = vsel %vm227_vm2, %v228_v37, %v226_v51  ;;  %v190_v36 = vsel %vm189_vm1, %v900_v15, %v188_v38 }
  0xb4   :  { %v176_v41 = vmul.f32 %v175_v28, %v907_v24  ;;  %v164_v47 = vmul.f32 %v163_v22, %v930_v50  ;;  %vm141_vm9 = vcmp.eq.f32.partialorder %v971_v25, inf  ;;  %vm143_vm10 = vcmp.eq.f32.partialorder %v971_v25, 0.0 }
  0xb5   :  { %v125_v42 = vmul.f32 0.5, %v124_v30  ;;  %v144_v32 = vand.u32 2147483648, %v971_v25  ;;  %v1115_v52 = vsel %vm215_vm3, %v216_v53, %v214_v21  ;;  %v1121_v37 = vsel %vm203_vm5, %v204_v9, %v202_v26 }
  0xb6   :  { %vm179_vm11 = vcmp.eq.f32.partialorder %v907_v24, 0.0  ;;  %v140_v49 = vmul.f32 %v139_v31, %v971_v25  ;;  %vm129_vm12 = vcmp.eq.f32.partialorder %v994_v33, inf  ;;  %v666_v57 = vpop.eup %665  ;;  %v1128_v3 = vsel %vm191_vm4, %v192_v45, %v190_v36 }
  0xb7   :  { %v126_v4 = vsub.f32 1.5, %v125_v42  ;;  %vm167_vm13 = vcmp.eq.f32.partialorder %v930_v50, 0.0  ;;  %v152_v54 = vmul.f32 %v151_v46, %v938_v59  ;;  %v132_v53 = vand.u32 2147483648, %v994_v33 }
  0xb8   :  { %v64_v11 = vmul.f32 %v1079_v34, %v63_v43  ;;  %v178_v9 = vsel %vm177_vm6, %v907_v24, %v176_v41  ;;  %vm155_vm14 = vcmp.eq.f32.partialorder %v938_v59, 0.0  ;;  %vm131_vm15 = vcmp.eq.f32.partialorder %v994_v33, 0.0  ;;  %v668_v62 = vpop.eup %667 }
  0xb9   :  { %v127_v61 = vmul.f32 %v662_v44, %v126_v4  ;;  %v72_v15 = vand.u32 2147483648, %v1022_v40  ;;  %v572_v45 = vmul.f32 %v666_v57, %v1072_v23  ;;  %v166_v60 = vsel %vm165_vm7, %v930_v50, %v164_v47 }
  0xba   :  { %vm576_vm0 = vweird.f32 %v1072_v23  ;;  %v580_v5 = vand.u32 2147483647, %v1072_v23  ;;  %v1147_v48 = vadd.f32 1e-05, %v968_v20  ;;  %v142_v44 = vsel %vm141_vm9, %v971_v25, %v140_v49 }
  0xbb   :  { %v573_v16 = vsub.f32 1.0, %v572_v45  ;;  %v582_v38 = vand.u32 2147483648, %v1072_v23  ;;  %v557_v28 = vmul.f32 %v668_v62, %v1077_v29  ;;  %v154_v30 = vsel %vm153_vm8, %v938_v59, %v152_v54 }
  0xbc   :  { %v65_v51 = vmul.f32 0.5, %v64_v11  ;;  %vm561_vm1 = vweird.f32 %v1077_v29  ;;  %v1159_v22 = vadd.f32 1e-05, %v1028_v27  ;;  %v128_v20 = vmul.f32 %v127_v61, %v994_v33 }
  0xbd   :  { %v574_v55 = vmul.f32 %v666_v57, %v573_v16  ;;  %vm577_vm2 = vweird.f32 %v666_v57  ;;  %v558_v21 = vsub.f32 1.0, %v557_v28  ;;  %v145_v26 = vsel %vm143_vm10, %v144_v32, %v142_v44 }
  0xbe   :  { %v567_v42 = vand.u32 2147483648, %v1077_v29  ;;  %669 = vrcp.f32 %v1147_v48  ;;  %v1167_v46 = vadd.f32 1e-05, %v980_v35  ;;  %vm562_vm3 = vweird.f32 %v668_v62  ;;  %vm578_vm4 = vmor %vm576_vm0, %vm577_vm2 }
  0xbf   :  { %v575_v31 = vadd.f32 %v666_v57, %v574_v55  ;;  %v559_v43 = vmul.f32 %v668_v62, %v558_v21  ;;  %v565_v27 = vand.u32 2147483647, %v1077_v29  ;;  %v66_v36 = vsub.f32 1.5, %v65_v51  ;;  %vm563_vm6 = vmor %vm561_vm1, %vm562_vm3 }
  0xc0   :  { %vm581_vm5 = vcmp.eq.f32.partialorder %v580_v5, 8.507059e+37  ;;  %v583_v41 = vor.u32 1.1754944e-38, %v582_v38  ;;  %671 = vrcp.f32 %v1159_v22  ;;  %v1173_v25 = vadd.f32 1e-05, %v145_v26 }
  0xc1   :  { %v130_v35 = vsel %vm129_vm12, %v994_v33, %v128_v20  ;;  %v579_v4 = vsel %vm578_vm4, %v666_v57, %v575_v31  ;;  %v560_v47 = vadd.f32 %v668_v62, %v559_v43  ;;  %v1182_v32 = vsel %vm179_vm11, %v180_v17, %v178_v9 }
  0xc2   :  { %v584_v23 = vsel %vm581_vm5, %v583_v41, %v579_v4  ;;  %v568_v49 = vor.u32 1.1754944e-38, %v567_v42  ;;  %673 = vrcp.f32 %v1167_v46  ;;  %v1191_v54 = vsel %vm167_vm13, %v168_v58, %v166_v60 }
  0xc3   :  { %v585_v57 = vmul.f32 %v584_v23, %v809_v0  ;;  %v564_v11 = vsel %vm563_vm6, %v668_v62, %v560_v47  ;;  %vm566_vm7 = vcmp.eq.f32.partialorder %v565_v27, 8.507059e+37  ;;  %v1198_v17 = vsel %vm155_vm14, %v156_v63, %v154_v30 }
  0xc4   :  { %v670_v24 = vpop.eup %669  ;;  %v133_v29 = vsel %vm131_vm15, %v132_v53, %v130_v35  ;;  %v67_v9 = vmul.f32 %v1079_v34, %v66_v36  ;;  %v569_v61 = vsel %vm566_vm7, %v568_v49, %v564_v11  ;;  %675 = vrcp.f32 %v1173_v25 }
  0xc5   :  { %vm69_vm8 = vcmp.eq.f32.partialorder %v1022_v40, inf  ;;  %586 = vmatpush.xpose.msra.mxu0 %v585_v57  ;;  %v570_v0 = vmul.f32 %v569_v61, %v821_v6  ;;  %v542_v50 = vmul.f32 %v670_v24, %v1147_v48  ;;  %v1208_v58 = vadd.f32 1e-05, %v1041_v39 }
  0xc6   :  { %v672_v59 = vpop.eup %671  ;;  %vm546_vm9 = vweird.f32 %v1147_v48  ;;  %v550_v33 = vand.u32 2147483647, %v1147_v48  ;;  %v552_v34 = vand.u32 2147483648, %v1147_v48  ;;  %v1214_v63 = vadd.f32 1e-05, %v1070_v10 }
  0xc7   :  { %v1216_v53 = vadd.f32 1e-05, %v133_v29  ;;  %v543_v45 = vsub.f32 1.0, %v542_v50  ;;  %v527_v6 = vmul.f32 %v672_v59, %v1159_v22  ;;  %677 = vrcp.f32 %v1208_v58 }
  0xc8   :  { %v674_v62 = vpop.eup %673  ;;  %v68_v39 = vmul.f32 %v67_v9, %v1022_v40  ;;  %vm531_vm10 = vweird.f32 %v1159_v22  ;;  %679 = vrcp.f32 %v1214_v63  ;;  %v1224_v60 = vadd.f32 1e-05, %v1101_v56 }
  0xc9   :  { %587 = vmatpush.xpose.msra.mxu0 %v570_v0  ;;  %v544_v10 = vmul.f32 %v670_v24, %v543_v45  ;;  %vm547_vm11 = vweird.f32 %v670_v24  ;;  %v528_v5 = vsub.f32 1.0, %v527_v6  ;;  %v512_v44 = vmul.f32 %v674_v62, %v1167_v46 }
  0xca   :  { %vm1227_vm12 = vcmp.eq.f32.partialorder %v550_v33, 8.507059e+37  ;;  %v553_v38 = vor.u32 1.1754944e-38, %v552_v34  ;;  %v535_v28 = vand.u32 2147483647, %v1159_v22  ;;  %v537_v30 = vand.u32 2147483648, %v1159_v22  ;;  %v1233_v51 = vpop.eup %675  ;;  %vm548_vm14 = vmor %vm546_vm9, %vm547_vm11 }
  0xcb   :  { %v545_v20 = vadd.f32 %v670_v24, %v544_v10  ;;  %v529_v56 = vmul.f32 %v672_v59, %v528_v5  ;;  %vm532_vm13 = vweird.f32 %v672_v59  ;;  %v513_v55 = vsub.f32 1.0, %v512_v44 }
  0xcc   :  { %vm516_vm15 = vweird.f32 %v1167_v46  ;;  %v520_v21 = vand.u32 2147483647, %v1167_v46  ;;  %v522_v26 = vand.u32 2147483648, %v1167_v46  ;;  %681 = vrcp.f32 %v1224_v60  ;;  %vm533_vm2 = vmor %vm531_vm10, %vm532_vm13 }
  0xcd   :  { %v678_v42 = vpop.eup %677  ;;  %vm71_vm0 = vcmp.eq.f32.partialorder %v1022_v40, 0.0  ;;  %v549_v31 = vsel %vm548_vm14, %v670_v24, %v545_v20  ;;  %v530_v43 = vadd.f32 %v672_v59, %v529_v56  ;;  %v514_v27 = vmul.f32 %v674_v62, %v513_v55 }
  0xce   :  { %vm517_vm1 = vweird.f32 %v674_v62  ;;  %v1242_v36 = vpop.eup %679  ;;  %v554_v48 = vsel %vm1227_vm12, %v553_v38, %v549_v31  ;;  %vm536_vm3 = vcmp.eq.f32.partialorder %v535_v28, 8.507059e+37  ;;  %v538_v41 = vor.u32 1.1754944e-38, %v537_v30 }
  0xcf   :  { %v497_v35 = vmul.f32 %v678_v42, %v1208_v58  ;;  %v555_v4 = vmul.f32 %v554_v48, %v811_v1  ;;  %v534_v47 = vsel %vm533_vm2, %v672_v59, %v530_v43  ;;  %v515_v23 = vadd.f32 %v674_v62, %v514_v27  ;;  %vm1258_vm4 = vmor %vm516_vm15, %vm517_vm1 }
  0xd0   :  { %v482_v49 = vmul.f32 %v1242_v36, %v1214_v63  ;;  %v70_v57 = vsel %vm69_vm8, %v1022_v40, %v68_v39  ;;  %v539_v11 = vsel %vm536_vm3, %v538_v41, %v534_v47  ;;  %vm1262_vm5 = vcmp.eq.f32.partialorder %v520_v21, 8.507059e+37 }
  0xd1   :  { %v498_v1 = vsub.f32 1.0, %v497_v35  ;;  %588 = vmatpush.xpose.msra.mxu0 %v555_v4  ;;  %v519_v29 = vsel %vm1258_vm4, %v674_v62, %v515_v23  ;;  %v523_v9 = vor.u32 1.1754944e-38, %v522_v26  ;;  %v1269_v0 = vadd.f32 1e-05, %v1115_v52 }
  0xd2   :  { %v483_v61 = vsub.f32 1.0, %v482_v49  ;;  %v1271_v50 = vpop.eup %681  ;;  %vm502_vm6 = vweird.f32 %v678_v42  ;;  %v507_v59 = vand.u32 2147483648, %v1208_v58  ;;  %v1275_v33 = vadd.f32 1e-05, %v1121_v37 }
  0xd3   :  { %v499_v46 = vmul.f32 %v678_v42, %v498_v1  ;;  %v540_v34 = vmul.f32 %v539_v11, %v823_v7  ;;  %v505_v45 = vand.u32 2147483647, %v1208_v58  ;;  %v467_v62 = vmul.f32 %v1271_v50, %v1224_v60 }
  0xd4   :  { %v484_v6 = vmul.f32 %v1242_v36, %v483_v61  ;;  %v524_v52 = vsel %vm1262_vm5, %v523_v9, %v519_v29  ;;  %vm501_vm7 = vweird.f32 %v1208_v58  ;;  %683 = vrcp.f32 %v1269_v0 }
  0xd5   :  { %v500_v39 = vadd.f32 %v678_v42, %v499_v46  ;;  %589 = vmatpush.xpose.msra.mxu0 %v540_v34  ;;  %vm503_vm8 = vmor %vm501_vm7, %vm502_vm6  ;;  %vm487_vm9 = vweird.f32 %v1242_v36  ;;  %v468_v7 = vsub.f32 1.0, %v467_v62  ;;  %685 = vrcp.f32 %v1275_v33 }
  0xd6   :  { %v485_v37 = vadd.f32 %v1242_v36, %v484_v6  ;;  %v508_v5 = vor.u32 1.1754944e-38, %v507_v59  ;;  %v490_v44 = vand.u32 2147483647, %v1214_v63  ;;  %v492_v16 = vand.u32 2147483648, %v1214_v63 }
  0xd7   :  { %v504_v10 = vsel %vm503_vm8, %v678_v42, %v500_v39  ;;  %v525_v38 = vmul.f32 %v524_v52, %v813_v2  ;;  %vm506_vm10 = vcmp.eq.f32.partialorder %v505_v45, 8.507059e+37  ;;  %vm486_vm11 = vweird.f32 %v1214_v63 }
  0xd8   :  { %v469_v58 = vmul.f32 %v1271_v50, %v468_v7  ;;  %v73_v28 = vsel %vm71_vm0, %v72_v15, %v70_v57  ;;  %v509_v30 = vsel %vm506_vm10, %v508_v5, %v504_v10  ;;  %vm1298_vm12 = vmor %vm486_vm11, %vm487_vm9  ;;  %v475_v56 = vand.u32 2147483647, %v1224_v60 }
  0xd9   :  { %v477_v55 = vand.u32 2147483648, %v1224_v60  ;;  %590 = vmatpush.xpose.msra.mxu0 %v525_v38  ;;  %v489_v2 = vsel %vm1298_vm12, %v1242_v36, %v485_v37  ;;  %vm472_vm13 = vweird.f32 %v1271_v50  ;;  %v1310_v40 = vadd.f32 1e-05, %v1128_v3 }
  0xda   :  { %v470_v63 = vadd.f32 %v1271_v50, %v469_v58  ;;  %v684_v15 = vpop.eup %683  ;;  %687 = vrcp.f32 %v1216_v53  ;;  %vm491_vm14 = vcmp.eq.f32.partialorder %v490_v44, 8.507059e+37  ;;  %v493_v21 = vor.u32 1.1754944e-38, %v492_v16 }
  0xdb   :  { %v1314_v26 = vadd.f32 1e-05, %v1182_v32  ;;  %v1316_v42 = vpop.eup %685  ;;  %v510_v31 = vmul.f32 %v509_v30, %v825_v8  ;;  %vm471_vm15 = vweird.f32 %v1224_v60  ;;  %v452_v43 = vmul.f32 %v684_v15, %v1269_v0 }
  0xdc   :  { %689 = vrcp.f32 %v1310_v40  ;;  %v1322_v3 = vadd.f32 1e-05, %v73_v28  ;;  %v494_v27 = vsel %vm491_vm14, %v493_v21, %v489_v2  ;;  %vm1324_vm0 = vmor %vm471_vm15, %vm472_vm13  ;;  %v437_v32 = vmul.f32 %v1316_v42, %v1275_v33 }
  0xdd   :  { %v1331_v48 = vadd.f32 1e-05, %v1191_v54  ;;  %591 = vmatpush.xpose.msra.mxu0 %v510_v31  ;;  %v474_v8 = vsel %vm1324_vm0, %v1271_v50, %v470_v63  ;;  %vm476_vm1 = vcmp.eq.f32.partialorder %v475_v56, 8.507059e+37  ;;  %v478_v60 = vor.u32 1.1754944e-38, %v477_v55 }
  0xde   :  { %v453_v41 = vsub.f32 1.0, %v452_v43  ;;  %v462_v35 = vand.u32 2147483648, %v1269_v0  ;;  %v438_v4 = vsub.f32 1.0, %v437_v32  ;;  %691 = vrcp.f32 %v1314_v26 }
  0xdf   :  { %v1339_v47 = vadd.f32 1e-05, %v1198_v17  ;;  %v495_v23 = vmul.f32 %v494_v27, %v833_v12  ;;  %vm457_vm2 = vweird.f32 %v684_v15  ;;  %v460_v49 = vand.u32 2147483647, %v1269_v0 }
  0xe0   :  { %v454_v54 = vmul.f32 %v684_v15, %v453_v41  ;;  %v1343_v57 = vpop.eup %687  ;;  %v479_v11 = vsel %vm476_vm1, %v478_v60, %v474_v8  ;;  %v439_v22 = vmul.f32 %v1316_v42, %v438_v4  ;;  %v445_v24 = vand.u32 2147483647, %v1275_v33 }
  0xe1   :  { %693 = vrcp.f32 %v1331_v48  ;;  %592 = vmatpush.xpose.msra.mxu0 %v495_v23  ;;  %vm456_vm3 = vweird.f32 %v1269_v0  ;;  %vm442_vm4 = vweird.f32 %v1316_v42  ;;  %v447_v12 = vand.u32 2147483648, %v1275_v33 }
  0xe2   :  { %v690_v1 = vpop.eup %689  ;;  %v455_v29 = vadd.f32 %v684_v15, %v454_v54  ;;  %vm458_vm5 = vmor %vm456_vm3, %vm457_vm2  ;;  %v463_v17 = vor.u32 1.1754944e-38, %v462_v35  ;;  %v440_v9 = vadd.f32 %v1316_v42, %v439_v22  ;;  %695 = vrcp.f32 %v1339_v47 }
  0xe3   :  { %v422_v61 = vmul.f32 %v690_v1, %v1310_v40  ;;  %v480_v50 = vmul.f32 %v479_v11, %v835_v13  ;;  %vm461_vm6 = vcmp.eq.f32.partialorder %v460_v49, 8.507059e+37  ;;  %vm441_vm7 = vweird.f32 %v1275_v33 }
  0xe4   :  { %v459_v46 = vsel %vm458_vm5, %v684_v15, %v455_v29  ;;  %v692_v59 = vpop.eup %691  ;;  %697 = vrcp.f32 %v1322_v3  ;;  %vm1357_vm8 = vmor %vm441_vm7, %vm442_vm4  ;;  %vm1361_vm9 = vcmp.eq.f32.partialorder %v445_v24, 8.507059e+37  ;;  %v448_v62 = vor.u32 1.1754944e-38, %v447_v12 }
  0xe5   :  { %v464_v0 = vsel %vm461_vm6, %v463_v17, %v459_v46  ;;  %v423_v6 = vsub.f32 1.0, %v422_v61  ;;  %593 = vmatpush.xpose.msra.mxu0 %v480_v50  ;;  %v444_v13 = vsel %vm1357_vm8, %v1316_v42, %v440_v9  ;;  %v407_v33 = vmul.f32 %v692_v59, %v1314_v26 }
  0xe6   :  { %v362_v52 = vmul.f32 %v1233_v51, %v1173_v25  ;;  %vm427_vm10 = vweird.f32 %v690_v1  ;;  %v430_v7 = vand.u32 2147483647, %v1310_v40  ;;  %v432_v10 = vand.u32 2147483648, %v1310_v40 }
  0xe7   :  { %v694_v39 = vpop.eup %693  ;;  %v424_v37 = vmul.f32 %v690_v1, %v423_v6  ;;  %v465_v5 = vmul.f32 %v464_v0, %v837_v14  ;;  %vm426_vm11 = vweird.f32 %v1310_v40  ;;  %v408_v44 = vsub.f32 1.0, %v407_v33 }
  0xe8   :  { %v392_v16 = vmul.f32 %v694_v39, %v1331_v48  ;;  %v1376_v38 = vpop.eup %695  ;;  %v449_v58 = vsel %vm1361_vm9, %v448_v62, %v444_v13  ;;  %vm411_vm12 = vweird.f32 %v1314_v26  ;;  %v415_v30 = vand.u32 2147483647, %v1314_v26  ;;  %vm428_vm13 = vmor %vm426_vm11, %vm427_vm10 }
  0xe9   :  { %v425_v28 = vadd.f32 %v690_v1, %v424_v37  ;;  %594 = vmatpush.xpose.msra.mxu0 %v465_v5  ;;  %v409_v20 = vmul.f32 %v692_v59, %v408_v44  ;;  %vm412_vm14 = vweird.f32 %v692_v59  ;;  %v377_v56 = vmul.f32 %v1376_v38, %v1339_v47  ;;  %v701_v37 = vld [vmem:[#allocation5 + $0x10] sm:$0xff] }
  0xea   :  { %v393_v14 = vsub.f32 1.0, %v392_v16  ;;  %v1384_v55 = vpop.eup %697  ;;  %vm431_vm15 = vcmp.eq.f32.partialorder %v430_v7, 8.507059e+37  ;;  %v433_v63 = vor.u32 1.1754944e-38, %v432_v10  ;;  %v417_v40 = vand.u32 2147483648, %v1314_v26  ;;  %vm413_vm0 = vmor %vm411_vm12, %vm412_vm14 }
  0xeb   :  { %v429_v2 = vsel %vm428_vm13, %v690_v1, %v425_v28  ;;  %v450_v15 = vmul.f32 %v449_v58, %v845_v18  ;;  %v410_v21 = vadd.f32 %v692_v59, %v409_v20  ;;  %v378_v31 = vsub.f32 1.0, %v377_v56  ;;  %v699_v1 = vld [vmem:[#allocation5 + $0x20] sm:$0xff]  ;;  %v702_v58 = vld [vmem:[#allocation5 + $0x8] sm:$0xff] }
  0xec   :  { %v394_v42 = vmul.f32 %v694_v39, %v393_v14  ;;  %v434_v43 = vsel %vm431_vm15, %v433_v63, %v429_v2  ;;  %vm397_vm1 = vweird.f32 %v694_v39  ;;  %v363_v27 = vsub.f32 1.0, %v362_v52  ;;  %v703_v14 = vld [vmem:[#allocation5] sm:$0xff] }
  0xed   :  { %595 = vmatpush.xpose.msra.mxu0 %v450_v15  ;;  %v414_v36 = vsel %vm413_vm0, %v692_v59, %v410_v21  ;;  %v379_v8 = vmul.f32 %v1376_v38, %v378_v31  ;;  %v347_v60 = vmul.f32 %v1343_v57, %v1216_v53  ;;  %v418_v41 = vor.u32 1.1754944e-38, %v417_v40 }
  0xee   :  { %v395_v32 = vadd.f32 %v694_v39, %v394_v42  ;;  %v402_v18 = vand.u32 2147483648, %v1331_v48  ;;  %v435_v35 = vmul.f32 %v434_v43, %v847_v19  ;;  %vm416_vm2 = vcmp.eq.f32.partialorder %v415_v30, 8.507059e+37 }
  0xef   :  { %vm396_vm3 = vweird.f32 %v1331_v48  ;;  %v400_v26 = vand.u32 2147483647, %v1331_v48  ;;  %v419_v4 = vsel %vm416_vm2, %v418_v41, %v414_v36  ;;  %vm382_vm5 = vweird.f32 %v1376_v38 }
  0xf0   :  { %vm1397_vm4 = vmor %vm396_vm3, %vm397_vm1  ;;  %v364_v54 = vmul.f32 %v1233_v51, %v363_v27  ;;  %v380_v19 = vadd.f32 %v1376_v38, %v379_v8  ;;  %v348_v11 = vsub.f32 1.0, %v347_v60  ;;  %v316_v22 = vmul.f32 %v1384_v55, %v1322_v3 }
  0xf1   :  { %596 = vmatpush.xpose.msra.mxu0 %v435_v35  ;;  %v399_v49 = vsel %vm1397_vm4, %v694_v39, %v395_v32  ;;  %v403_v48 = vor.u32 1.1754944e-38, %v402_v18  ;;  %v387_v24 = vand.u32 2147483648, %v1339_v47  ;;  %v420_v29 = vmul.f32 %v699_v1, %v419_v4 }
  0xf2   :  { %vm401_vm6 = vcmp.eq.f32.partialorder %v400_v26, 8.507059e+37  ;;  %vm381_vm7 = vweird.f32 %v1339_v47  ;;  %v385_v12 = vand.u32 2147483647, %v1339_v47  ;;  %vm366_vm9 = vweird.f32 %v1173_v25  ;;  %v700_v47 = vld [vmem:[#allocation5 + $0x18] sm:$0xff] }
  0xf3   :  { %v404_v17 = vsel %vm401_vm6, %v403_v48, %v399_v49  ;;  %vm383_vm8 = vmor %vm381_vm7, %vm382_vm5  ;;  %v317_v9 = vsub.f32 1.0, %v316_v22  ;;  %v365_v50 = vadd.f32 %v1233_v51, %v364_v54  ;;  %vm367_vm10 = vweird.f32 %v1233_v51 }
  0xf4   :  { %v384_v61 = vsel %vm383_vm8, %v1376_v38, %v380_v19  ;;  %v349_v46 = vmul.f32 %v1343_v57, %v348_v11  ;;  %v388_v59 = vor.u32 1.1754944e-38, %v387_v24  ;;  %v372_v0 = vand.u32 2147483648, %v1173_v25  ;;  %vm368_vm12 = vmor %vm366_vm9, %vm367_vm10 }
  0xf5   :  { %597 = vmatpush.xpose.msra.mxu0 %v420_v29  ;;  %v405_v34 = vmul.f32 %v700_v47, %v404_v17  ;;  %vm386_vm11 = vcmp.eq.f32.partialorder %v385_v12, 8.507059e+37  ;;  %v370_v45 = vand.u32 2147483647, %v1173_v25  ;;  %v318_v13 = vmul.f32 %v1384_v55, %v317_v9 }
  0xf6   :  { %v389_v6 = vsel %vm386_vm11, %v388_v59, %v384_v61  ;;  %v369_v62 = vsel %vm368_vm12, %v1233_v51, %v365_v50  ;;  %v350_v33 = vadd.f32 %v1343_v57, %v349_v46  ;;  %vm352_vm13 = vweird.f32 %v1343_v57 }
  0xf7   :  { %v373_v52 = vor.u32 1.1754944e-38, %v372_v0  ;;  %v357_v39 = vand.u32 2147483648, %v1216_v53  ;;  %v390_v7 = vmul.f32 %v701_v37, %v389_v6  ;;  %vm371_vm14 = vcmp.eq.f32.partialorder %v370_v45, 8.507059e+37 }
  0xf8   :  { %vm351_vm15 = vweird.f32 %v1216_v53  ;;  %v355_v25 = vand.u32 2147483647, %v1216_v53  ;;  %v319_v5 = vadd.f32 %v1384_v55, %v318_v13  ;;  %vm320_vm1 = vweird.f32 %v1322_v3 }
  0xf9   :  { %598 = vmatpush.xpose.msra.mxu0 %v405_v34  ;;  %v374_v10 = vsel %vm371_vm14, %v373_v52, %v369_v62  ;;  %vm353_vm0 = vmor %vm351_vm15, %vm352_vm13  ;;  %vm321_vm2 = vweird.f32 %v1384_v55  ;;  %v326_v44 = vand.u32 2147483648, %v1322_v3  ;;  %v358_v16 = vor.u32 1.1754944e-38, %v357_v39 }
  0xfa   :  { %v354_v51 = vsel %vm353_vm0, %v1343_v57, %v350_v33  ;;  %v324_v38 = vand.u32 2147483647, %v1322_v3  ;;  %v375_v28 = vmul.f32 %v702_v58, %v374_v10  ;;  %vm356_vm3 = vcmp.eq.f32.partialorder %v355_v25, 8.507059e+37  ;;  %vm322_vm4 = vmor %vm320_vm1, %vm321_vm2  ;;  %v704_v57 = vld [vmem:[#allocation2] sm:$0xff] }
  0xfb   :  { %v359_v53 = vsel %vm356_vm3, %v358_v16, %v354_v51  ;;  %v323_v30 = vsel %vm322_vm4, %v1384_v55, %v319_v5  ;;  %v327_v20 = vor.u32 1.1754944e-38, %v326_v44 }
  0xfc   :  { %vm325_vm5 = vcmp.eq.f32.partialorder %v324_v38, 8.507059e+37  ;;  %v360_v56 = vmul.f32 %v703_v14, %v359_v53 }
  0xfd   :  { %599 = vmatpush.xpose.msra.mxu0 %v390_v7  ;;  %v328_v2 = vsel %vm325_vm5, %v327_v20, %v323_v30 }
  0xfe   :  { %v329_v63 = vmul.f32 %v704_v57, %v328_v2 }
 0x101   :  { %600 = vmatpush.xpose.msra.mxu0 %v375_v28 }
 0x105   :  { %601 = vmatpush.xpose.msra.mxu0 %v360_v56 }
 0x108   :  { %602 = vmatmul.f32.vlgmr.msra.gmra.mxu0 %v329_v63 }
 0x185   :  { %v603_v3 = vpop.f32.mrf.mxu0 }
 0x186   :  { %v606_v40 = vmul.f32 10.0, %v603_v3 }
 0x188   :  { %607 = vst [vmem:[#allocation7] sm:$0xff] %v606_v40 }
 0x189   :  { %618 = dma.vmem_to_hbm [thread:$0]  %s614_s1, 128, %s616_s23, [#allocation4]  }
 0x18a   :  { %781 = dma.done.wait [#allocation4], 128  }
 0x18b   :  { %782 = vsyncadd [#allocation4], 4294967168 }
 0x18c   :  { %623 = vsyncpa [#allocation3], 1 }
 0x18d   :  { %624 = vsyncpa [#allocation6], 1 }
 0x18e   :  { %625 = vsyncpa [#allocation4], 1 }

</bundles_post_ra>
